<compile_context>
chip_gen: v5e
topology: v5e:2x2
jax: 0.10.0
libtpu: 0.0.40
codegen_flags: <defaults>
</compile_context>

<pallas_src>
import jax
import jax.numpy as jnp
from jax.experimental import pallas as pl
from jax.experimental.pallas import tpu as pltpu


def _round_up(x: int, m: int) -> int:
    return (x + m - 1) // m * m


def _nbytes(shape, dtype) -> int:
    n = 1
    for d in shape:
        n *= int(d)
    return n * jnp.dtype(dtype).itemsize


def _make_encoder_kernel(n_hidden: int, batch: int, m_pad: int,
                         latent_dims: int, latent_pad: int):
    """Kernel for a fixed (static) number of hidden layers.

    Grid: 1-D over K-tiles of the first (largest) hidden layer.
    refs = x, W0, b0, (W_i, b_i)*(n_hidden-1), W_head, b_head, eps,
           z_out, kl_out, acc_scratch
    """
    inv_count = 1.0 / float(batch * latent_dims)
    need_row_mask = batch < m_pad

    def kernel(*refs):
        idx = 0
        x_ref = refs[idx]; idx += 1
        w0_ref = refs[idx]; idx += 1
        b0_ref = refs[idx]; idx += 1
        rest_hidden = []
        for _ in range(n_hidden - 1):
            rest_hidden.append((refs[idx], refs[idx + 1]))
            idx += 2
        wh_ref = refs[idx]; bh_ref = refs[idx + 1]; idx += 2
        eps_ref = refs[idx]; idx += 1
        z_ref = refs[idx]; kl_ref = refs[idx + 1]; idx += 2
        acc_ref = refs[idx]

        k = pl.program_id(0)

        @pl.when(k == 0)
        def _():
            acc_ref[...] = jnp.zeros_like(acc_ref)

        # K-tiled first-layer matmul: bf16 inputs, f32 accumulation on MXU.
        acc_ref[...] += jnp.dot(x_ref[...], w0_ref[...],
                                preferred_element_type=jnp.float32)

        @pl.when(k == pl.num_programs(0) - 1)
        def _():
            # Remaining (small) layers run once, on the final K step.
            h = jnp.maximum(acc_ref[...] + b0_ref[...], 0.0)  # f32 ReLU
            for w_ref, b_ref in rest_hidden:
                h = jnp.dot(h.astype(jnp.bfloat16), w_ref[...],
                            preferred_element_type=jnp.float32) + b_ref[...]
                h = jnp.maximum(h, 0.0)

            # Fused mean|sigma head: one MXU launch, then split lanes at a
            # 128-multiple boundary (free).
            head = jnp.dot(h.astype(jnp.bfloat16), wh_ref[...],
                           preferred_element_type=jnp.float32) + bh_ref[...]
            mu = head[:, :latent_pad]
            log_sig = head[:, latent_pad:]
            sig = jnp.exp(log_sig)                       # EUP

            # Reparameterize: z = mu + sigma * eps
            z_ref[...] = (mu + sig * eps_ref[...]).astype(z_ref.dtype)

            # KL(N(mu, sig) || N(0, 1)) from log-sigma (stable, no log(exp)).
            # Padded latent cols contribute exactly 0 (mu=0, log_sig=0).
            kl_elem = -log_sig + 0.5 * (sig * sig + mu * mu) - 0.5
            if need_row_mask:
                row = jax.lax.broadcasted_iota(jnp.int32, kl_elem.shape, 0)
                kl_elem = jnp.where(row < batch, kl_elem, 0.0)
            kl_ref[0, 0] = jnp.sum(kl_elem) * inv_count

    return kernel


def init_params(key, input_image_size: int, hdim, latent_dims: int):
    """PyTorch-Linear-style init: U(-1/sqrt(fan_in), +1/sqrt(fan_in))."""
    input_dim = input_image_size ** 2 * 4
    dims = [input_dim] + list(hdim)
    params = {"hidden": [], "mean": None, "sigma": None}

    def linear(key, fan_in, fan_out):
        kw, kb = jax.random.split(key)
        bound = 1.0 / jnp.sqrt(float(fan_in))
        w = jax.random.uniform(kw, (fan_in, fan_out), jnp.float32, -bound, bound)
        b = jax.random.uniform(kb, (1, fan_out), jnp.float32, -bound, bound)
        return w, b

    keys = jax.random.split(key, len(hdim) + 2)
    for i in range(len(hdim)):
        params["hidden"].append(linear(keys[i], dims[i], dims[i + 1]))
    feat_dim = dims[-1]
    params["mean"] = linear(keys[len(hdim)], feat_dim, latent_dims)
    params["sigma"] = linear(keys[len(hdim) + 1], feat_dim, latent_dims)
    return params


def make_encoder_global(params, input_image_size: int, latent_dims: int):
    """Pads/casts the weights ONCE and returns a jitted
    forward(rgb_with_object, object_mask, eps) -> (z, kl)."""
    hidden = params["hidden"]
    n_hidden = len(hidden)
    in_dim = input_image_size ** 2 * 4

    # --- padded geometry (batch-independent part) ---
    tile_k = min(1024, _round_up(in_dim, 128))        # K tile for layer 0
    k_pad = _round_up(in_dim, tile_k)
    h_pads = [_round_up(w.shape[1], 128) for (w, _) in hidden]
    latent_pad = _round_up(latent_dims, 128)
    head_pad = 2 * latent_pad
    feat_pad = h_pads[-1]
    grid_k = k_pad // tile_k

    def pad2(a, r, c, dtype):
        return jnp.pad(a, ((0, r - a.shape[0]), (0, c - a.shape[1]))).astype(dtype)

    # --- pad / cast weights once (eager, out of the hot path) ---
    w0, b0 = hidden[0]
    w0_p = pad2(w0, k_pad, h_pads[0], jnp.bfloat16)
    b0_p = pad2(b0, 1, h_pads[0], jnp.float32)

    rest = []
    prev = h_pads[0]
    for i in range(1, n_hidden):
        w, b = hidden[i]
        rest.append((pad2(w, prev, h_pads[i], jnp.bfloat16),
                     pad2(b, 1, h_pads[i], jnp.float32)))
        prev = h_pads[i]

    # Fused mean|sigma head weights.
    w_mu, b_mu = params["mean"]
    w_sg, b_sg = params["sigma"]
    w_head = jnp.zeros((feat_pad, head_pad), jnp.float32)
    w_head = w_head.at[:w_mu.shape[0], :latent_dims].set(w_mu)
    w_head = w_head.at[:w_sg.shape[0], latent_pad:latent_pad + latent_dims].set(w_sg)
    w_head = w_head.astype(jnp.bfloat16)
    b_head = jnp.zeros((1, head_pad), jnp.float32)
    b_head = b_head.at[:, :latent_dims].set(b_mu)
    b_head = b_head.at[:, latent_pad:latent_pad + latent_dims].set(b_sg)

    weight_operands = [w0_p, b0_p]
    for (w_p, b_p) in rest:
        weight_operands += [w_p, b_p]
    weight_operands += [w_head, b_head]

    @jax.jit
    def forward(rgb_with_object, object_mask, eps):
        n = rgb_with_object.shape[0]

        # --- glue: resize (bilinear) + flatten + concat (not the hot path) ---
        # TODO(synk): torchvision TF.resize antialiases on downscale;
        # jax.image.resize('bilinear') does not — identical when the input is
        # already at input_image_size (as in the test below).
        rgb_r = jax.image.resize(
            rgb_with_object,
            (n, rgb_with_object.shape[1], input_image_size, input_image_size),
            method="bilinear")
        mask_r = jax.image.resize(
            object_mask.astype(jnp.float32),
            (n, object_mask.shape[1], input_image_size, input_image_size),
            method="bilinear")
        x = jnp.concatenate([rgb_r.reshape(n, -1), mask_r.reshape(n, -1)],
                            axis=1).astype(jnp.float32)

        m_pad = _round_up(max(n, 1), 16)              # bf16 sublane tile
        x_p = jnp.pad(x, ((0, m_pad - n), (0, k_pad - x.shape[1]))
                      ).astype(jnp.bfloat16)
        eps_p = jnp.pad(eps.astype(jnp.float32),
                        ((0, m_pad - n), (0, latent_pad - eps.shape[1])))

        def const_spec(shape):
            return pl.BlockSpec(shape, lambda k: (0, 0))

        in_specs = [
            pl.BlockSpec((m_pad, tile_k), lambda k: (0, k)),      # x (K-tiled)
            pl.BlockSpec((tile_k, h_pads[0]), lambda k: (k, 0)),  # W0 (K-tiled)
            const_spec((1, h_pads[0])),                           # b0
        ]
        for (w_p, b_p) in rest:
            in_specs += [const_spec(w_p.shape), const_spec(b_p.shape)]
        in_specs += [const_spec((feat_pad, head_pad)),            # W_head
                     const_spec((1, head_pad)),                   # b_head
                     const_spec((m_pad, latent_pad))]             # eps

        out_specs = (
            pl.BlockSpec((m_pad, latent_pad), lambda k: (0, 0)),  # z (lane-dense)
            pl.BlockSpec((1, 1), lambda k: (0, 0),
                         memory_space=pltpu.MemorySpace.SMEM),    # kl scalar
        )
        out_shape = (
            jax.ShapeDtypeStruct((m_pad, latent_pad), jnp.float32),
            jax.ShapeDtypeStruct((1, 1), jnp.float32),
        )

        operands = [x_p, w0_p, b0_p]
        for (w_p, b_p) in rest:
            operands += [w_p, b_p]
        operands += [w_head, b_head, eps_p]

        # --- VMEM budget (pipelined block bytes x2 + scratch + headroom) ---
        block_bytes = (_nbytes((m_pad, tile_k), jnp.bfloat16)
                       + _nbytes((tile_k, h_pads[0]), jnp.bfloat16)
                       + _nbytes((1, h_pads[0]), jnp.float32))
        for (w_p, b_p) in rest:
            block_bytes += _nbytes(w_p.shape, w_p.dtype)
            block_bytes += _nbytes(b_p.shape, b_p.dtype)
        block_bytes += _nbytes((feat_pad, head_pad), jnp.bfloat16)
        block_bytes += _nbytes((1, head_pad), jnp.float32)
        block_bytes += _nbytes((m_pad, latent_pad), jnp.float32)   # eps
        block_bytes += _nbytes((m_pad, latent_pad), jnp.float32)   # z out
        scratch_bytes = _nbytes((m_pad, h_pads[0]), jnp.float32)
        vmem_limit = min(
            max(2 * block_bytes + scratch_bytes + (8 << 20), 32 << 20), 64 << 20)

        # --- cost estimate (lets XLA schedule the glue around us) ---
        flops = 2 * m_pad * k_pad * h_pads[0]
        prev_d = h_pads[0]
        for hp in h_pads[1:]:
            flops += 2 * m_pad * prev_d * hp
            prev_d = hp
        flops += 2 * m_pad * feat_pad * head_pad
        transcendentals = m_pad * latent_pad
        bytes_accessed = (sum(_nbytes(op.shape, op.dtype) for op in operands)
                          + _nbytes((m_pad, latent_pad), jnp.float32) + 4)
        cost = pl.CostEstimate(flops=int(flops),
                               transcendentals=int(transcendentals),
                               bytes_accessed=int(bytes_accessed))

        kernel = _make_encoder_kernel(n_hidden, n, m_pad, latent_dims, latent_pad)

        z_pad, kl = pl.pallas_call(
            kernel,
            out_shape=out_shape,
            grid_spec=pltpu.PrefetchScalarGridSpec(
                num_scalar_prefetch=0,
                grid=(grid_k,),
                in_specs=in_specs,
                out_specs=out_specs,
                scratch_shapes=[pltpu.VMEM((m_pad, h_pads[0]), jnp.float32)]),
            compiler_params=pltpu.CompilerParams(
                dimension_semantics=("arbitrary",),
                vmem_limit_bytes=int(vmem_limit)),
            cost_estimate=cost,
        )(*operands)

        return z_pad[:n, :latent_dims], kl[0, 0]

    return forward


def _reference_forward(params, rgb, mask, eps):
    """Pure-JAX fp32 reference for correctness checking."""
    n = rgb.shape[0]
    x = jnp.concatenate(
        [rgb.reshape(n, -1), mask.astype(jnp.float32).reshape(n, -1)], axis=1)
    h = x
    for w, b in params["hidden"]:
        h = jnp.maximum(h @ w + b, 0.0)
    mu = h @ params["mean"][0] + params["mean"][1]
    sig = jnp.exp(h @ params["sigma"][0] + params["sigma"][1])
    z = mu + sig * eps
    kl = jnp.mean(-jnp.log(sig) + 0.5 * (sig * sig + mu * mu) - 0.5)
    return z, kl


if __name__ == "__main__":
    # Small shapes consistent with the module: input image already at
    # input_image_size so the resize is an identity.
    batch = 2
    input_image_size = 16
    hdim = [32, 32]
    latent_dims = 8

    key = jax.random.PRNGKey(0)
    k_param, k_rgb, k_mask, k_eps = jax.random.split(key, 4)

    params = init_params(k_param, input_image_size, hdim, latent_dims)
    forward = make_encoder_global(params, input_image_size, latent_dims)

    rgb_with_object = jax.random.normal(
        k_rgb, (batch, 3, input_image_size, input_image_size), jnp.float32)
    object_mask = (
        jax.random.uniform(k_mask, (batch, 1, input_image_size, input_image_size))
        > 0.5
    ).astype(jnp.float32)
    eps = jax.random.normal(k_eps, (batch, latent_dims), jnp.float32)

    z, kl = forward(rgb_with_object, object_mask, eps)
    z = jax.block_until_ready(z)
    kl = jax.block_until_ready(kl)

    z_ref, kl_ref = _reference_forward(params, rgb_with_object, object_mask, eps)
    assert z.shape == (batch, latent_dims)
    # bf16 matmul inputs with f32 accumulation vs fp32 reference: loose tolerance.
    assert jnp.allclose(z, z_ref, atol=3e-2, rtol=3e-2), (z, z_ref)
    assert jnp.allclose(kl, kl_ref, atol=1e-2, rtol=3e-2), (kl, kl_ref)

    print("KERNEL_OK")
</pallas_src>

<mosaic_0001>
module attributes {stable_mosaic.version = 11 : i64} {
  func.func @kernel(%arg0: i32, %arg1: memref<16x1024xbf16, #tpu.memory_space<vmem>>, %arg2: memref<1024x128xbf16, #tpu.memory_space<vmem>>, %arg3: memref<1x128xf32, #tpu.memory_space<vmem>>, %arg4: memref<128x128xbf16, #tpu.memory_space<vmem>>, %arg5: memref<1x128xf32, #tpu.memory_space<vmem>>, %arg6: memref<128x256xbf16, #tpu.memory_space<vmem>>, %arg7: memref<1x256xf32, #tpu.memory_space<vmem>>, %arg8: memref<16x128xf32, #tpu.memory_space<vmem>>, %arg9: memref<16x128xf32, #tpu.memory_space<vmem>>, %arg10: memref<1x1xf32, #tpu.memory_space<smem>>, %arg11: memref<16x128xf32, #tpu.memory_space<vmem>>) attributes {dimension_semantics = [#tpu.dimension_semantics<arbitrary>], iteration_bounds = array<i64: 1>, scalar_prefetch = 0 : i64, scratch_operands = 1 : i64, tpu.core_type = #tpu.core_type<tc>, window_params = [{transform_indices = @transform_0, window_bounds = array<i64: 16, 1024>}, {transform_indices = @transform_1, window_bounds = array<i64: 1024, 128>}, {pipeline_mode = #tpu.pipeline_mode<synchronous>, transform_indices = @transform_2, window_bounds = array<i64: 1, 128>}, {pipeline_mode = #tpu.pipeline_mode<synchronous>, transform_indices = @transform_3, window_bounds = array<i64: 128, 128>}, {pipeline_mode = #tpu.pipeline_mode<synchronous>, transform_indices = @transform_4, window_bounds = array<i64: 1, 128>}, {pipeline_mode = #tpu.pipeline_mode<synchronous>, transform_indices = @transform_5, window_bounds = array<i64: 128, 256>}, {pipeline_mode = #tpu.pipeline_mode<synchronous>, transform_indices = @transform_6, window_bounds = array<i64: 1, 256>}, {pipeline_mode = #tpu.pipeline_mode<synchronous>, transform_indices = @transform_7, window_bounds = array<i64: 16, 128>}, {pipeline_mode = #tpu.pipeline_mode<synchronous>, transform_indices = @transform_8, window_bounds = array<i64: 16, 128>}, {transform_indices = @transform_9, window_bounds = array<i64: 1, 1>}]} {
    %c0_i32 = arith.constant 0 : i32
    %0 = arith.cmpi eq, %arg0, %c0_i32 : i32
    %1 = arith.extui %0 : i1 to i32
    %c0_i32_0 = arith.constant 0 : i32
    %2 = arith.cmpi ne, %1, %c0_i32_0 : i32
    scf.if %2 {
      %cst_10 = arith.constant 0.000000e+00 : f32
      %12 = vector.broadcast %cst_10 : f32 to vector<16x128xf32>
      %c0_11 = arith.constant 0 : index
      %c0_12 = arith.constant 0 : index
      %13 = vector.load %arg11[%c0_11, %c0_12] : memref<16x128xf32, #tpu.memory_space<vmem>>, vector<16x128xf32>
      tpu.vector_store %arg11[%c0_11, %c0_12], %12 {strides = array<i32>} : memref<16x128xf32, #tpu.memory_space<vmem>>, vector<16x128xf32>,
    } else {
    }
    %c0 = arith.constant 0 : index
    %c0_1 = arith.constant 0 : index
    %3 = vector.load %arg11[%c0, %c0_1] : memref<16x128xf32, #tpu.memory_space<vmem>>, vector<16x128xf32>
    %c0_2 = arith.constant 0 : index
    %c0_3 = arith.constant 0 : index
    %4 = vector.load %arg1[%c0_2, %c0_3] : memref<16x1024xbf16, #tpu.memory_space<vmem>>, vector<16x1024xbf16>
    %c0_4 = arith.constant 0 : index
    %c0_5 = arith.constant 0 : index
    %5 = vector.load %arg2[%c0_4, %c0_5] : memref<1024x128xbf16, #tpu.memory_space<vmem>>, vector<1024x128xbf16>
    %cst = arith.constant dense<0.000000e+00> : vector<16x128xf32>
    %6 = tpu.matmul %4, %5, %cst {dimension_numbers = #tpu.dot_dimension_numbers<[1], [0], [0], [1], [0, 0, 1, 1], [], []>} : vector<16x1024xbf16>, vector<1024x128xbf16>, vector<16x128xf32> -> vector<16x128xf32>
    %7 = arith.addf %3, %6 : vector<16x128xf32>
    %c0_6 = arith.constant 0 : index
    %c0_7 = arith.constant 0 : index
    %8 = vector.load %arg11[%c0_6, %c0_7] : memref<16x128xf32, #tpu.memory_space<vmem>>, vector<16x128xf32>
    tpu.vector_store %arg11[%c0_6, %c0_7], %7 {strides = array<i32>} : memref<16x128xf32, #tpu.memory_space<vmem>>, vector<16x128xf32>,
    %c0_i32_8 = arith.constant 0 : i32
    %9 = arith.cmpi eq, %arg0, %c0_i32_8 : i32
    %10 = arith.extui %9 : i1 to i32
    %c0_i32_9 = arith.constant 0 : i32
    %11 = arith.cmpi ne, %10, %c0_i32_9 : i32
    scf.if %11 {
      %c0_10 = arith.constant 0 : index
      %c0_11 = arith.constant 0 : index
      %12 = vector.load %arg11[%c0_10, %c0_11] : memref<16x128xf32, #tpu.memory_space<vmem>>, vector<16x128xf32>
      %c0_12 = arith.constant 0 : index
      %c0_13 = arith.constant 0 : index
      %13 = vector.load %arg3[%c0_12, %c0_13] : memref<1x128xf32, #tpu.memory_space<vmem>>, vector<1x128xf32>
      %14 = vector.broadcast %13 : vector<1x128xf32> to vector<16x128xf32>
      %15 = arith.addf %12, %14 : vector<16x128xf32>
      %cst_14 = arith.constant 0.000000e+00 : f32
      %16 = vector.broadcast %cst_14 : f32 to vector<16x128xf32>
      %17 = arith.maximumf %15, %16 : vector<16x128xf32>
      %18 = arith.truncf %17 : vector<16x128xf32> to vector<16x128xbf16>
      %c0_15 = arith.constant 0 : index
      %c0_16 = arith.constant 0 : index
      %19 = vector.load %arg4[%c0_15, %c0_16] : memref<128x128xbf16, #tpu.memory_space<vmem>>, vector<128x128xbf16>
      %cst_17 = arith.constant dense<0.000000e+00> : vector<16x128xf32>
      %20 = tpu.matmul %18, %19, %cst_17 {dimension_numbers = #tpu.dot_dimension_numbers<[1], [0], [0], [1], [0, 0, 1, 1], [], []>} : vector<16x128xbf16>, vector<128x128xbf16>, vector<16x128xf32> -> vector<16x128xf32>
      %c0_18 = arith.constant 0 : index
      %c0_19 = arith.constant 0 : index
      %21 = vector.load %arg5[%c0_18, %c0_19] : memref<1x128xf32, #tpu.memory_space<vmem>>, vector<1x128xf32>
      %22 = vector.broadcast %21 : vector<1x128xf32> to vector<16x128xf32>
      %23 = arith.addf %20, %22 : vector<16x128xf32>
      %cst_20 = arith.constant 0.000000e+00 : f32
      %24 = vector.broadcast %cst_20 : f32 to vector<16x128xf32>
      %25 = arith.maximumf %23, %24 : vector<16x128xf32>
      %26 = arith.truncf %25 : vector<16x128xf32> to vector<16x128xbf16>
      %c0_21 = arith.constant 0 : index
      %c0_22 = arith.constant 0 : index
      %27 = vector.load %arg6[%c0_21, %c0_22] : memref<128x256xbf16, #tpu.memory_space<vmem>>, vector<128x256xbf16>
      %cst_23 = arith.constant dense<0.000000e+00> : vector<16x256xf32>
      %28 = tpu.matmul %26, %27, %cst_23 {dimension_numbers = #tpu.dot_dimension_numbers<[1], [0], [0], [1], [0, 0, 1, 1], [], []>} : vector<16x128xbf16>, vector<128x256xbf16>, vector<16x256xf32> -> vector<16x256xf32>
      %c0_24 = arith.constant 0 : index
      %c0_25 = arith.constant 0 : index
      %29 = vector.load %arg7[%c0_24, %c0_25] : memref<1x256xf32, #tpu.memory_space<vmem>>, vector<1x256xf32>
      %30 = vector.broadcast %29 : vector<1x256xf32> to vector<16x256xf32>
      %31 = arith.addf %28, %30 : vector<16x256xf32>
      %32 = vector.extract_strided_slice %31 {offsets = [0, 0], sizes = [16, 128], strides = [1, 1]} : vector<16x256xf32> to vector<16x128xf32>
      %33 = vector.extract_strided_slice %31 {offsets = [0, 128], sizes = [16, 128], strides = [1, 1]} : vector<16x256xf32> to vector<16x128xf32>
      %34 = math.exp %33 : vector<16x128xf32>
      %c0_26 = arith.constant 0 : index
      %c0_27 = arith.constant 0 : index
      %35 = vector.load %arg8[%c0_26, %c0_27] : memref<16x128xf32, #tpu.memory_space<vmem>>, vector<16x128xf32>
      %36 = arith.mulf %34, %35 : vector<16x128xf32>
      %37 = arith.addf %32, %36 : vector<16x128xf32>
      %c0_28 = arith.constant 0 : index
      %c0_29 = arith.constant 0 : index
      %38 = vector.load %arg9[%c0_28, %c0_29] : memref<16x128xf32, #tpu.memory_space<vmem>>, vector<16x128xf32>
      tpu.vector_store %arg9[%c0_28, %c0_29], %37 {strides = array<i32>} : memref<16x128xf32, #tpu.memory_space<vmem>>, vector<16x128xf32>,
      %cst_30 = arith.constant 0.000000e+00 : f32
      %39 = vector.broadcast %cst_30 : f32 to vector<16x128xf32>
      %40 = arith.subf %39, %33 : vector<16x128xf32>
      %41 = arith.mulf %34, %34 : vector<16x128xf32>
      %42 = arith.mulf %32, %32 : vector<16x128xf32>
      %43 = arith.addf %41, %42 : vector<16x128xf32>
      %cst_31 = arith.constant 5.000000e-01 : f32
      %44 = vector.broadcast %cst_31 : f32 to vector<16x128xf32>
      %45 = arith.mulf %44, %43 : vector<16x128xf32>
      %46 = arith.addf %40, %45 : vector<16x128xf32>
      %cst_32 = arith.constant 5.000000e-01 : f32
      %47 = vector.broadcast %cst_32 : f32 to vector<16x128xf32>
      %48 = arith.subf %46, %47 : vector<16x128xf32>
      %49 = tpu.iota {dimensions = array<i32: 0>} : vector<16x128xi32>
      %c2_i32 = arith.constant 2 : i32
      %50 = vector.broadcast %c2_i32 : i32 to vector<16x128xi32>
      %51 = arith.cmpi slt, %49, %50 : vector<16x128xi32>
      %cst_33 = arith.constant 0.000000e+00 : f32
      %52 = vector.broadcast %cst_33 : f32 to vector<16x128xf32>
      %53 = arith.select %51, %48, %52 : vector<16x128xi1>, vector<16x128xf32>
      %54 = vector.shape_cast %53 : vector<16x128xf32> to vector<1x16x128xf32>
      %cst_34 = arith.constant dense<0.000000e+00> : vector<1xf32>
      %55 = vector.multi_reduction <add>, %54, %cst_34 [1, 2] : vector<1x16x128xf32> to vector<1xf32>
      %56 = vector.shape_cast %55 : vector<1xf32> to vector<1x1x1xf32>
      %57 = vector.extract %56[0, 0, 0] : f32 from vector<1x1x1xf32>
      %cst_35 = arith.constant 6.250000e-02 : f32
      %58 = arith.mulf %57, %cst_35 : f32
      %c0_36 = arith.constant 0 : index
      %c0_37 = arith.constant 0 : index
      %59 = memref.load %arg10[%c0_36, %c0_37] : memref<1x1xf32, #tpu.memory_space<smem>>
      memref.store %58, %arg10[%c0_36, %c0_37] : memref<1x1xf32, #tpu.memory_space<smem>>
    } else {
    }
    return
  }
  func.func @transform_0(%arg0: i32) -> (i32, i32) {
    %c0_i32 = arith.constant 0 : i32
    %c0_i32_0 = arith.constant 0 : i32
    return %c0_i32, %arg0 : i32, i32
  }
  func.func @transform_1(%arg0: i32) -> (i32, i32) {
    %c0_i32 = arith.constant 0 : i32
    %c0_i32_0 = arith.constant 0 : i32
    return %arg0, %c0_i32 : i32, i32
  }
  func.func @transform_2(%arg0: i32) -> (i32, i32) {
    %c0_i32 = arith.constant 0 : i32
    %c0_i32_0 = arith.constant 0 : i32
    %c0_i32_1 = arith.constant 0 : i32
    return %c0_i32, %c0_i32_0 : i32, i32
  }
  func.func @transform_3(%arg0: i32) -> (i32, i32) {
    %c0_i32 = arith.constant 0 : i32
    %c0_i32_0 = arith.constant 0 : i32
    %c0_i32_1 = arith.constant 0 : i32
    return %c0_i32, %c0_i32_0 : i32, i32
  }
  func.func @transform_4(%arg0: i32) -> (i32, i32) {
    %c0_i32 = arith.constant 0 : i32
    %c0_i32_0 = arith.constant 0 : i32
    %c0_i32_1 = arith.constant 0 : i32
    return %c0_i32, %c0_i32_0 : i32, i32
  }
  func.func @transform_5(%arg0: i32) -> (i32, i32) {
    %c0_i32 = arith.constant 0 : i32
    %c0_i32_0 = arith.constant 0 : i32
    %c0_i32_1 = arith.constant 0 : i32
    return %c0_i32, %c0_i32_0 : i32, i32
  }
  func.func @transform_6(%arg0: i32) -> (i32, i32) {
    %c0_i32 = arith.constant 0 : i32
    %c0_i32_0 = arith.constant 0 : i32
    %c0_i32_1 = arith.constant 0 : i32
    return %c0_i32, %c0_i32_0 : i32, i32
  }
  func.func @transform_7(%arg0: i32) -> (i32, i32) {
    %c0_i32 = arith.constant 0 : i32
    %c0_i32_0 = arith.constant 0 : i32
    %c0_i32_1 = arith.constant 0 : i32
    return %c0_i32, %c0_i32_0 : i32, i32
  }
  func.func @transform_8(%arg0: i32) -> (i32, i32) {
    %c0_i32 = arith.constant 0 : i32
    %c0_i32_0 = arith.constant 0 : i32
    %c0_i32_1 = arith.constant 0 : i32
    return %c0_i32, %c0_i32_0 : i32, i32
  }
  func.func @transform_9(%arg0: i32) -> (i32, i32) {
    %c0_i32 = arith.constant 0 : i32
    %c0_i32_0 = arith.constant 0 : i32
    %c0_i32_1 = arith.constant 0 : i32
    return %c0_i32, %c0_i32_0 : i32, i32
  }
}

</mosaic_0001>

<bundles_post_ra>
// kernel: forward.1
= control target key start
LH: loop header
LB: loop body
LE: loop exit
PB: predicated region body
PF: predicated region fallthrough
CT: control target
= control target key end

     0   :  { %15 = vsyncpa [#allocation4], 0  ;;  %s1810_s0 = inlined_call_operand.vmem [shape: bf16[16,1024], index: 0, kind: input, shape index: {}]   ;;  %s1811_s1 = inlined_call_operand.hbm [shape: bf16[1024,128], index: 1, kind: input, shape index: {}]   ;;  %s1812_s2 = inlined_call_operand.vmem [shape: f32[1,128], index: 2, kind: input, shape index: {}]   ;;  %s1813_s3 = inlined_call_operand.vmem [shape: bf16[128,128], index: 3, kind: input, shape index: {}]   ;;  %s1814_s4 = inlined_call_operand.vmem [shape: f32[1,128], index: 4, kind: input, shape index: {}]   ;;  %s1815_s5 = inlined_call_operand.vmem [shape: bf16[128,256], index: 5, kind: input, shape index: {}]   ;;  %s1816_s6 = inlined_call_operand.vmem [shape: f32[1,256], index: 6, kind: input, shape index: {}]   ;;  %s1817_s7 = inlined_call_operand.vmem [shape: f32[16,128], index: 7, kind: input, shape index: {}]   ;;  %s1818_s8 = inlined_call_operand.vmem [shape: f32[16,128], index: 8, kind: output, shape index: {0}]   ;;  %s1819_s9 = inlined_call_operand.hbm [shape: f32[1,1], index: 9, kind: output, shape index: {1}]  }
   0x1   :  { %16 = vsyncpa [#allocation5], 0  ;;  %s23_s11 = sshll.u32 %s1811_s1, 4  ;;  %s1561_s12 = smov [#allocation3]   ;;  %s24_s11 = int_to_ptr.hbm [resolvable:$true] %s23_s11 }
   0x2   :  { %s25_s13 = sshll.u32 %s1561_s12, 4  ;;  %s1562_s14 = smov 64   ;;  %s26_s13 = int_to_ptr.vmem [resolvable:$true] %s25_s13 }
   0x3   :  { %s1563_s15 = smov 4  }
   0x4   :  { %31 = dma.hbm_to_vmem [thread:$0]  %s24_s11, 8192, %s26_s13, [#allocation4], %s1562_s14, %s1562_s14, %s1563_s15  }
   0x5   :  { %1557 = dma.done.wait [#allocation4], 8192  }
   0x6   :  { %1558 = vsyncadd [#allocation4], 4294959104  ;;  %v1428_v0 = vld [vmem:[#allocation3 + $0x38] sm:$0xff]  ;;  %v1427_v4 = vld [vmem:[#allocation3 + $0x30] sm:$0xff]  ;;  %s1014_s20 = sshll.u32 %s1819_s9, 4  ;;  %s1564_s23 = smov [#allocation6]   ;;  %s1015_s20 = int_to_ptr.hbm [resolvable:$true] %s1014_s20 }
   0x7   :  { %v1436_v1 = vld [vmem:[#allocation3 + $0x78] sm:$0xff]  ;;  %616 = vmatpush.bf16.msra.mxu0 %v1428_v0  ;;  %v1435_v5 = vld [vmem:[#allocation3 + $0x70] sm:$0xff]  ;;  %v1426_v8 = vld [vmem:[#allocation3 + $0x28] sm:$0xff] }
   0x8   :  { %v1444_v2 = vld [vmem:[#allocation3 + $0xb8] sm:$0xff]  ;;  %630 = vmatpush.bf16.msra.mxu1 %v1436_v1  ;;  %v1443_v6 = vld [vmem:[#allocation3 + $0xb0] sm:$0xff]  ;;  %v1434_v9 = vld [vmem:[#allocation3 + $0x68] sm:$0xff] }
   0x9   :  { %v1452_v3 = vld [vmem:[#allocation3 + $0xf8] sm:$0xff]  ;;  %644 = vmatpush.bf16.msra.mxu2 %v1444_v2  ;;  %v1451_v7 = vld [vmem:[#allocation3 + $0xf0] sm:$0xff]  ;;  %v1442_v10 = vld [vmem:[#allocation3 + $0xa8] sm:$0xff] }
   0xa   :  { %658 = vmatpush.bf16.msra.mxu3 %v1452_v3  ;;  %v1450_v11 = vld [vmem:[#allocation3 + $0xe8] sm:$0xff]  ;;  %v1425_v12 = vld [vmem:[#allocation3 + $0x20] sm:$0xff]  ;;  %v1424_v16 = vld [vmem:[#allocation3 + $0x18] sm:$0xff] }
   0xb   :  { %617 = vmatpush.bf16.msra.mxu0 %v1427_v4  ;;  %v1433_v13 = vld [vmem:[#allocation3 + $0x60] sm:$0xff]  ;;  %v1432_v17 = vld [vmem:[#allocation3 + $0x58] sm:$0xff]  ;;  %v1423_v20 = vld [vmem:[#allocation3 + $0x10] sm:$0xff] }
   0xc   :  { %631 = vmatpush.bf16.msra.mxu1 %v1435_v5  ;;  %v1441_v14 = vld [vmem:[#allocation3 + $0xa0] sm:$0xff]  ;;  %v1440_v18 = vld [vmem:[#allocation3 + $0x98] sm:$0xff]  ;;  %v1431_v21 = vld [vmem:[#allocation3 + $0x50] sm:$0xff] }
   0xd   :  { %645 = vmatpush.bf16.msra.mxu2 %v1443_v6  ;;  %v1449_v15 = vld [vmem:[#allocation3 + $0xe0] sm:$0xff]  ;;  %v1448_v19 = vld [vmem:[#allocation3 + $0xd8] sm:$0xff]  ;;  %v1439_v22 = vld [vmem:[#allocation3 + $0x90] sm:$0xff] }
   0xe   :  { %659 = vmatpush.bf16.msra.mxu3 %v1451_v7  ;;  %v1447_v23 = vld [vmem:[#allocation3 + $0xd0] sm:$0xff]  ;;  %v1422_v24 = vld [vmem:[#allocation3 + $0x8] sm:$0xff]  ;;  %v1421_v28 = vld [vmem:[#allocation3] sm:$0xff] }
   0xf   :  { %618 = vmatpush.bf16.msra.mxu0 %v1426_v8  ;;  %v1430_v25 = vld [vmem:[#allocation3 + $0x48] sm:$0xff]  ;;  %v1429_v29 = vld [vmem:[#allocation3 + $0x40] sm:$0xff]  ;;  %v1460_v32 = vld [vmem:[#allocation3 + $0x138] sm:$0xff] }
  0x10   :  { %632 = vmatpush.bf16.msra.mxu1 %v1434_v9  ;;  %v1438_v26 = vld [vmem:[#allocation3 + $0x88] sm:$0xff]  ;;  %v1437_v30 = vld [vmem:[#allocation3 + $0x80] sm:$0xff]  ;;  %v1468_v33 = vld [vmem:[#allocation3 + $0x178] sm:$0xff] }
  0x11   :  { %646 = vmatpush.bf16.msra.mxu2 %v1442_v10  ;;  %v1446_v27 = vld [vmem:[#allocation3 + $0xc8] sm:$0xff]  ;;  %v1445_v31 = vld [vmem:[#allocation3 + $0xc0] sm:$0xff]  ;;  %v1476_v42 = vld [vmem:[#allocation3 + $0x1b8] sm:$0xff] }
  0x12   :  { %660 = vmatpush.bf16.msra.mxu3 %v1450_v11  ;;  %v1037_v34 = vld [vmem:[%s1810_s0 + $0x8] sm:$0xf]  ;;  %v1414_v36 = vld [vmem:[%s1810_s0 + $0xc] sm:$0xf]  ;;  %v1029_v38 = vld [vmem:[%s1810_s0] sm:$0xf] }
  0x13   :  { %619 = vmatpush.bf16.msra.mxu0 %v1425_v12  ;;  %v1418_v35 = vld [vmem:[%s1810_s0 + $0x24] sm:$0xf0]  ;;  %v1039_v37 = vld [vmem:[%s1810_s0 + $0x28] sm:$0xf0]  ;;  %v1417_v39 = vld [vmem:[%s1810_s0 + $0x1c] sm:$0xf0] }
  0x14   :  { %633 = vmatpush.bf16.msra.mxu1 %v1433_v13  ;;  %v1413_v40 = vld [vmem:[%s1810_s0 + $0x4] sm:$0xf]  ;;  %v1484_v43 = vld [vmem:[#allocation3 + $0x1f8] sm:$0xff]  ;;  %v1038_v44 = vor.u32 %v1418_v35, %v1037_v34  ;;  %v1042_v45 = vor.u32 %v1414_v36, %v1039_v37  ;;  %v1030_v46 = vor.u32 %v1417_v39, %v1029_v38  ;;  %v1459_v48 = vld [vmem:[#allocation3 + $0x130] sm:$0xff] }
  0x15   :  { %647 = vmatpush.bf16.msra.mxu2 %v1441_v14  ;;  %v1031_v41 = vld [vmem:[%s1810_s0 + $0x20] sm:$0xf0]  ;;  %v1467_v49 = vld [vmem:[#allocation3 + $0x170] sm:$0xff]  ;;  %v1458_v52 = vld [vmem:[#allocation3 + $0x128] sm:$0xff] }
  0x16   :  { %661 = vmatpush.bf16.msra.mxu3 %v1449_v15  ;;  %v1034_v47 = vor.u32 %v1413_v40, %v1031_v41  ;;  %v1475_v50 = vld [vmem:[#allocation3 + $0x1b0] sm:$0xff]  ;;  %v1466_v53 = vld [vmem:[#allocation3 + $0x168] sm:$0xff]  ;;  %v1457_v56 = vld [vmem:[#allocation3 + $0x120] sm:$0xff] }
  0x17   :  { %620 = vmatpush.bf16.msra.mxu0 %v1424_v16  ;;  %v1483_v51 = vld [vmem:[#allocation3 + $0x1f0] sm:$0xff]  ;;  %v1474_v54 = vld [vmem:[#allocation3 + $0x1a8] sm:$0xff]  ;;  %v1465_v57 = vld [vmem:[#allocation3 + $0x160] sm:$0xff] }
  0x18   :  { %634 = vmatpush.bf16.msra.mxu1 %v1432_v17  ;;  %v1482_v55 = vld [vmem:[#allocation3 + $0x1e8] sm:$0xff]  ;;  %v1473_v58 = vld [vmem:[#allocation3 + $0x1a0] sm:$0xff]  ;;  %v1456_v60 = vld [vmem:[#allocation3 + $0x118] sm:$0xff] }
  0x19   :  { %648 = vmatpush.bf16.msra.mxu2 %v1440_v18  ;;  %v1481_v59 = vld [vmem:[#allocation3 + $0x1e0] sm:$0xff]  ;;  %v1464_v61 = vld [vmem:[#allocation3 + $0x158] sm:$0xff]  ;;  %v1455_v0 = vld [vmem:[#allocation3 + $0x110] sm:$0xff] }
  0x1a   :  { %662 = vmatpush.bf16.msra.mxu3 %v1448_v19  ;;  %v1472_v62 = vld [vmem:[#allocation3 + $0x198] sm:$0xff]  ;;  %v1463_v1 = vld [vmem:[#allocation3 + $0x150] sm:$0xff]  ;;  %v1454_v4 = vld [vmem:[#allocation3 + $0x108] sm:$0xff] }
  0x1b   :  { %621 = vmatpush.bf16.msra.mxu0 %v1423_v20  ;;  %v1480_v63 = vld [vmem:[#allocation3 + $0x1d8] sm:$0xff]  ;;  %v1471_v2 = vld [vmem:[#allocation3 + $0x190] sm:$0xff]  ;;  %v1462_v5 = vld [vmem:[#allocation3 + $0x148] sm:$0xff] }
  0x1c   :  { %635 = vmatpush.bf16.msra.mxu1 %v1431_v21  ;;  %v1479_v3 = vld [vmem:[#allocation3 + $0x1d0] sm:$0xff]  ;;  %v1470_v6 = vld [vmem:[#allocation3 + $0x188] sm:$0xff]  ;;  %v1453_v8 = vld [vmem:[#allocation3 + $0x100] sm:$0xff] }
  0x1d   :  { %649 = vmatpush.bf16.msra.mxu2 %v1439_v22  ;;  %v1478_v7 = vld [vmem:[#allocation3 + $0x1c8] sm:$0xff]  ;;  %v1461_v9 = vld [vmem:[#allocation3 + $0x140] sm:$0xff]  ;;  %v1045_v12 = vld [vmem:[%s1810_s0 + $0x10] sm:$0xf] }
  0x1e   :  { %663 = vmatpush.bf16.msra.mxu3 %v1447_v23  ;;  %v1469_v10 = vld [vmem:[#allocation3 + $0x180] sm:$0xff]  ;;  %v1419_v13 = vld [vmem:[%s1810_s0 + $0x2c] sm:$0xf0]  ;;  %v1415_v14 = vld [vmem:[%s1810_s0 + $0x14] sm:$0xf] }
  0x1f   :  { %622 = vmatpush.bf16.msra.mxu0 %v1422_v24  ;;  %v1477_v11 = vld [vmem:[#allocation3 + $0x1c0] sm:$0xff]  ;;  %v1047_v15 = vld [vmem:[%s1810_s0 + $0x30] sm:$0xf0]  ;;  %v1053_v16 = vld [vmem:[%s1810_s0 + $0x18] sm:$0xf]  ;;  %v1046_v20 = vor.u32 %v1419_v13, %v1045_v12 }
  0x20   :  { %636 = vmatpush.bf16.msra.mxu1 %v1430_v25  ;;  %v1420_v17 = vld [vmem:[%s1810_s0 + $0x34] sm:$0xf0]  ;;  %v1416_v18 = vld [vmem:[%s1810_s0 + $0x1c] sm:$0xf]  ;;  %v1050_v21 = vor.u32 %v1415_v14, %v1047_v15  ;;  %v1491_v25 = vld [vmem:[%s1813_s3 + $0x30] sm:$0xff] }
  0x21   :  { %650 = vmatpush.bf16.msra.mxu2 %v1438_v26  ;;  %v1055_v19 = vld [vmem:[%s1810_s0 + $0x38] sm:$0xf0]  ;;  %v1054_v22 = vor.u32 %v1420_v17, %v1053_v16  ;;  %v1490_v26 = vld [vmem:[%s1813_s3 + $0x28] sm:$0xff]  ;;  %v1485_v35 = vld [vmem:[%s1813_s3] sm:$0xff] }
  0x22   :  { %664 = vmatpush.bf16.msra.mxu3 %v1446_v27  ;;  %v1058_v23 = vor.u32 %v1416_v18, %v1055_v19  ;;  %v1492_v24 = vld [vmem:[%s1813_s3 + $0x38] sm:$0xff]  ;;  %v1489_v27 = vld [vmem:[%s1813_s3 + $0x20] sm:$0xff]  ;;  %v1405_v38 = vld [vmem:[%s1815_s5 + $0x70] sm:$0xf] }
  0x23   :  { %623 = vmatpush.bf16.msra.mxu0 %v1421_v28  ;;  %v1488_v28 = vld [vmem:[%s1813_s3 + $0x18] sm:$0xff]  ;;  %v1507_v40 = vld [vmem:[%s1815_s5 + $0x74] sm:$0xf]  ;;  %v1515_v17 = vld [vmem:[%s1812_s2] ss:$0 sm:$0xff] }
  0x24   :  { %637 = vmatpush.bf16.msra.mxu1 %v1429_v29  ;;  %v1487_v29 = vld [vmem:[%s1813_s3 + $0x10] sm:$0xff]  ;;  %v1508_v39 = vld [vmem:[%s1815_s5 + $0x74] sm:$0xf0] }
  0x25   :  { %651 = vmatpush.bf16.msra.mxu2 %v1437_v30 }
  0x26   :  { %665 = vmatpush.bf16.msra.mxu3 %v1445_v31  ;;  %624 = vmatmul.bf16.vlgmr.msra.gmra.mxu0 %v1030_v46 }
  0x27   :  { %672 = vmatpush.bf16.msrb.mxu0 %v1460_v32  ;;  %638 = vmatmul.bf16.vlgmr.msra.gmra.mxu1 %v1034_v47  ;;  %v1486_v32 = vld [vmem:[%s1813_s3 + $0x8] sm:$0xff]  ;;  %v1505_v47 = vld [vmem:[%s1815_s5 + $0x64] sm:$0xf] }
  0x28   :  { %686 = vmatpush.bf16.msrb.mxu1 %v1468_v33  ;;  %652 = vmatmul.bf16.vlgmr.msra.gmra.mxu2 %v1038_v44  ;;  %v1397_v44 = vld [vmem:[%s1815_s5 + $0x60] sm:$0xf] }
  0x29   :  { %700 = vmatpush.bf16.msrb.mxu2 %v1476_v42  ;;  %666 = vmatmul.bf16.vlgmr.msra.gmra.mxu3 %v1042_v45  ;;  %v1406_v42 = vor.u32 %v1508_v39, %v1405_v38  ;;  %v1506_v45 = vld [vmem:[%s1815_s5 + $0x64] sm:$0xf0]  ;;  %v1367_v38 = vld [vmem:[%s1815_s5 + $0x28] sm:$0xf0] }
  0x2a   :  { %714 = vmatpush.bf16.msrb.mxu3 %v1484_v43  ;;  %v1407_v43 = vld [vmem:[%s1815_s5 + $0x78] sm:$0xf0] }
  0x2b   :  { %673 = vmatpush.bf16.msrb.mxu0 %v1459_v48  ;;  %v1410_v46 = vor.u32 %v1507_v40, %v1407_v43  ;;  %v1399_v48 = vld [vmem:[%s1815_s5 + $0x68] sm:$0xf0]  ;;  %v1357_v40 = vld [vmem:[%s1815_s5 + $0x10] sm:$0xf] }
  0x2c   :  { %687 = vmatpush.bf16.msrb.mxu1 %v1467_v49  ;;  %v1398_v49 = vor.u32 %v1506_v45, %v1397_v44  ;;  %v1359_v44 = vld [vmem:[%s1815_s5 + $0x18] sm:$0xf0] }
  0x2d   :  { %701 = vmatpush.bf16.msrb.mxu2 %v1475_v50 }
  0x2e   :  { %715 = vmatpush.bf16.msrb.mxu3 %v1483_v51  ;;  %v1402_v51 = vor.u32 %v1505_v47, %v1399_v48  ;;  %v1494_v47 = vld [vmem:[%s1815_s5 + $0x4] sm:$0xf0]  ;;  %v1493_v48 = vld [vmem:[%s1815_s5 + $0x4] sm:$0xf] }
  0x2f   :  { %674 = vmatpush.bf16.msrb.mxu0 %v1458_v52  ;;  %v1389_v52 = vld [vmem:[%s1815_s5 + $0x50] sm:$0xf] }
  0x30   :  { %688 = vmatpush.bf16.msrb.mxu1 %v1466_v53  ;;  %v1504_v53 = vld [vmem:[%s1815_s5 + $0x54] sm:$0xf0] }
  0x31   :  { %702 = vmatpush.bf16.msrb.mxu2 %v1474_v54 }
  0x32   :  { %716 = vmatpush.bf16.msrb.mxu3 %v1482_v55 }
  0x33   :  { %675 = vmatpush.bf16.msrb.mxu0 %v1457_v56  ;;  %v1503_v56 = vld [vmem:[%s1815_s5 + $0x54] sm:$0xf] }
  0x34   :  { %689 = vmatpush.bf16.msrb.mxu1 %v1465_v57  ;;  %v1391_v57 = vld [vmem:[%s1815_s5 + $0x58] sm:$0xf0] }
  0x35   :  { %703 = vmatpush.bf16.msrb.mxu2 %v1473_v58 }
  0x36   :  { %717 = vmatpush.bf16.msrb.mxu3 %v1481_v59 }
  0x37   :  { %676 = vmatpush.bf16.msrb.mxu0 %v1456_v60  ;;  %v1390_v60 = vor.u32 %v1504_v53, %v1389_v52  ;;  %v1516_v53 = vld [vmem:[%s1814_s4] ss:$0 sm:$0xff] }
  0x38   :  { %690 = vmatpush.bf16.msrb.mxu1 %v1464_v61 }
  0x39   :  { %704 = vmatpush.bf16.msrb.mxu2 %v1472_v62  ;;  %v1394_v62 = vor.u32 %v1503_v56, %v1391_v57 }
  0x3a   :  { %718 = vmatpush.bf16.msrb.mxu3 %v1480_v63  ;;  %v1381_v63 = vld [vmem:[%s1815_s5 + $0x40] sm:$0xf] }
  0x3b   :  { %677 = vmatpush.bf16.msrb.mxu0 %v1455_v0  ;;  %v1502_v0 = vld [vmem:[%s1815_s5 + $0x44] sm:$0xf0] }
  0x3c   :  { %691 = vmatpush.bf16.msrb.mxu1 %v1463_v1 }
  0x3d   :  { %705 = vmatpush.bf16.msrb.mxu2 %v1471_v2  ;;  %v1501_v2 = vld [vmem:[%s1815_s5 + $0x44] sm:$0xf] }
  0x3e   :  { %719 = vmatpush.bf16.msrb.mxu3 %v1479_v3  ;;  %v1383_v3 = vld [vmem:[%s1815_s5 + $0x48] sm:$0xf0] }
  0x3f   :  { %678 = vmatpush.bf16.msrb.mxu0 %v1454_v4 }
  0x40   :  { %692 = vmatpush.bf16.msrb.mxu1 %v1462_v5 }
  0x41   :  { %706 = vmatpush.bf16.msrb.mxu2 %v1470_v6  ;;  %v1382_v6 = vor.u32 %v1502_v0, %v1381_v63 }
  0x42   :  { %720 = vmatpush.bf16.msrb.mxu3 %v1478_v7  ;;  %v1386_v7 = vor.u32 %v1501_v2, %v1383_v3 }
  0x43   :  { %679 = vmatpush.bf16.msrb.mxu0 %v1453_v8 }
  0x44   :  { %693 = vmatpush.bf16.msrb.mxu1 %v1461_v9 }
  0x45   :  { %707 = vmatpush.bf16.msrb.mxu2 %v1469_v10 }
  0x46   :  { %721 = vmatpush.bf16.msrb.mxu3 %v1477_v11  ;;  %680 = vmatmul.bf16.vlgmr.msrb.gmra.mxu0 %v1046_v20 }
  0x47   :  { %694 = vmatmul.bf16.vlgmr.msrb.gmra.mxu1 %v1050_v21  ;;  %814 = vmatpush.bf16.msra.mxu0 %v1492_v24 }
  0x48   :  { %708 = vmatmul.bf16.vlgmr.msrb.gmra.mxu2 %v1054_v22  ;;  %933 = vmatpush.bf16.msra.mxu1 %v1406_v42  ;;  %v1495_v42 = vld [vmem:[%s1815_s5 + $0x14] sm:$0xf] }
  0x49   :  { %722 = vmatmul.bf16.vlgmr.msrb.gmra.mxu3 %v1058_v23  ;;  %947 = vmatpush.bf16.msra.mxu2 %v1410_v46  ;;  %v1362_v45 = vor.u32 %v1495_v42, %v1359_v44  ;;  %v1349_v46 = vld [vmem:[%s1815_s5] sm:$0xf] }
  0x4b   :  { %815 = vmatpush.bf16.msra.mxu0 %v1491_v25 }
  0x4c   :  { %934 = vmatpush.bf16.msra.mxu1 %v1398_v49  ;;  %v1350_v49 = vor.u32 %v1494_v47, %v1349_v46 }
  0x4d   :  { %948 = vmatpush.bf16.msra.mxu2 %v1402_v51 }
  0x4f   :  { %816 = vmatpush.bf16.msra.mxu0 %v1490_v26 }
  0x50   :  { %935 = vmatpush.bf16.msra.mxu1 %v1390_v60  ;;  %v847_v60 = vld [vmem:[%s1816_s6] sm:$0x3] }
  0x51   :  { %949 = vmatpush.bf16.msra.mxu2 %v1394_v62 }
  0x53   :  { %817 = vmatpush.bf16.msra.mxu0 %v1489_v27 }
  0x54   :  { %936 = vmatpush.bf16.msra.mxu1 %v1382_v6 }
  0x55   :  { %950 = vmatpush.bf16.msra.mxu2 %v1386_v7 }
  0x57   :  { %818 = vmatpush.bf16.msra.mxu0 %v1488_v28  ;;  %v1373_v28 = vld [vmem:[%s1815_s5 + $0x30] sm:$0xf] }
  0x5b   :  { %819 = vmatpush.bf16.msra.mxu0 %v1487_v29  ;;  %v1500_v29 = vld [vmem:[%s1815_s5 + $0x34] sm:$0xf0] }
  0x5f   :  { %820 = vmatpush.bf16.msra.mxu0 %v1486_v32  ;;  %v1375_v32 = vld [vmem:[%s1815_s5 + $0x38] sm:$0xf0] }
  0x63   :  { %821 = vmatpush.bf16.msra.mxu0 %v1485_v35  ;;  %v1498_v35 = vld [vmem:[%s1815_s5 + $0x24] sm:$0xf0] }
  0xa3   :  { %v625_v30 = vpop.f32.mrf.mxu0 }
  0xa4   :  { %v639_v31 = vpop.f32.mrf.mxu1 }
  0xa5   :  { %v640_v37 = vadd.f32 %v639_v31, %v625_v30  ;;  %v1499_v30 = vld [vmem:[%s1815_s5 + $0x34] sm:$0xf]  ;;  %v1374_v31 = vor.u32 %v1500_v29, %v1373_v28 }
  0xa7   :  { %937 = vmatpush.bf16.msra.mxu1 %v1374_v31 }
  0xab   :  { %v653_v33 = vpop.f32.mrf.mxu2  ;;  %v627_v36 = vpop.f32.mrf.mxu0 }
  0xac   :  { %v667_v34 = vpop.f32.mrf.mxu3  ;;  %v641_v41 = vpop.f32.mrf.mxu1  ;;  %v654_v50 = vadd.f32 %v653_v33, %v640_v37  ;;  %v1378_v33 = vor.u32 %v1499_v30, %v1375_v32 }
  0xad   :  { %v642_v58 = vadd.f32 %v641_v41, %v627_v36  ;;  %v1497_v36 = vld [vmem:[%s1815_s5 + $0x24] sm:$0xf]  ;;  %v1496_v41 = vld [vmem:[%s1815_s5 + $0x14] sm:$0xf0] }
  0xae   :  { %v668_v61 = vadd.f32 %v667_v34, %v654_v50  ;;  %951 = vmatpush.bf16.msra.mxu2 %v1378_v33  ;;  %v1365_v34 = vld [vmem:[%s1815_s5 + $0x20] sm:$0xf]  ;;  %v1370_v39 = vor.u32 %v1497_v36, %v1367_v38  ;;  %v1358_v43 = vor.u32 %v1496_v41, %v1357_v40  ;;  %v1351_v50 = vld [vmem:[%s1815_s5 + $0x8] sm:$0xf0] }
  0xaf   :  { %v1366_v37 = vor.u32 %v1498_v35, %v1365_v34  ;;  %v1354_v51 = vor.u32 %v1493_v48, %v1351_v50 }
  0xb1   :  { %938 = vmatpush.bf16.msra.mxu1 %v1366_v37 }
  0xb2   :  { %952 = vmatpush.bf16.msra.mxu2 %v1370_v39 }
  0xb3   :  { %v655_v54 = vpop.f32.mrf.mxu2 }
  0xb4   :  { %v669_v55 = vpop.f32.mrf.mxu3  ;;  %v656_v4 = vadd.f32 %v655_v54, %v642_v58 }
  0xb5   :  { %939 = vmatpush.bf16.msra.mxu1 %v1358_v43 }
  0xb6   :  { %v670_v10 = vadd.f32 %v669_v55, %v656_v4  ;;  %953 = vmatpush.bf16.msra.mxu2 %v1362_v45 }
  0xb9   :  { %940 = vmatpush.bf16.msra.mxu1 %v1350_v49 }
  0xba   :  { %954 = vmatpush.bf16.msra.mxu2 %v1354_v51 }
  0xc3   :  { %v681_v59 = vpop.f32.mrf.mxu0 }
  0xc4   :  { %v695_v1 = vpop.f32.mrf.mxu1  ;;  %v682_v5 = vadd.f32 %v681_v59, %v668_v61  ;;  %v850_v61 = vperm.slane %v847_v60, 1 }
  0xc6   :  { %v696_v11 = vadd.f32 %v695_v1, %v682_v5  ;;  %v849_v1 = vperm.slane %v847_v60, 0  ;;  %v965_v5 = vld [vmem:[%s1817_s7] sm:$0xff] }
  0xcb   :  { %v709_v8 = vpop.f32.mrf.mxu2  ;;  %v683_v12 = vpop.f32.mrf.mxu0 }
  0xcc   :  { %v723_v9 = vpop.f32.mrf.mxu3  ;;  %v710_v13 = vadd.f32 %v709_v8, %v696_v11  ;;  %v684_v14 = vadd.f32 %v683_v12, %v670_v10  ;;  %v697_v15 = vpop.f32.mrf.mxu1 }
  0xce   :  { %v724_v16 = vadd.f32 %v723_v9, %v710_v13  ;;  %v698_v18 = vadd.f32 %v697_v15, %v684_v14  ;;  %v987_v9 = vlaneseq }
  0xd0   :  { %v741_v22 = vadd.f32 %v1515_v17, %v724_v16  ;;  %v988_v15 = vshrl.u32 %v987_v9, 7 }
  0xd2   :  { %v743_v25 = vmax.f32 %v741_v22, 0.0  ;;  %vm990_vm0 = vcmp.lt.s32.totalorder %v988_v15, 2 }
  0xd3   :  { %v711_v19 = vpop.f32.mrf.mxu2 }
  0xd4   :  { %v712_v20 = vadd.f32 %v711_v19, %v698_v18  ;;  %v725_v21 = vpop.f32.mrf.mxu3  ;;  %v966_v19 = vld [vmem:[%s1817_s7 + $0x8] sm:$0xff] }
  0xd6   :  { %v726_v23 = vadd.f32 %v725_v21, %v712_v20 }
  0xd8   :  { %v742_v24 = vadd.f32 %v1515_v17, %v726_v23 }
  0xda   :  { %v744_v26 = vmax.f32 %v742_v24, 0.0 }
  0xdc   :  { %v745_v27 = vpack.c.bf16 %v744_v26, %v743_v25 }
  0xde   :  { %822 = vmatmul.bf16.vlgmr.msra.gmra.mxu0 %v745_v27 }
 0x15b   :  { %v823_v52 = vpop.f32.mrf.mxu0 }
 0x15c   :  { %v824_v54 = vadd.f32 %v1516_v53, %v823_v52 }
 0x15e   :  { %v828_v57 = vmax.f32 %v824_v54, 0.0 }
 0x163   :  { %v825_v55 = vpop.f32.mrf.mxu0 }
 0x164   :  { %v826_v56 = vadd.f32 %v1516_v53, %v825_v55 }
 0x166   :  { %v829_v58 = vmax.f32 %v826_v56, 0.0 }
 0x168   :  { %v830_v59 = vpack.c.bf16 %v829_v58, %v828_v57 }
 0x16a   :  { %941 = vmatmul.bf16.vlgmr.msra.gmra.mxu1 %v830_v59  ;;  %955 = vmatmul.bf16.vlgmr.msra.gmra.mxu2 %v830_v59 }
 0x1e7   :  { %v942_v2 = vpop.f32.mrf.mxu1 }
 0x1e8   :  { %v943_v3 = vadd.f32 %v942_v2, %v849_v1 }
 0x1ea   :  { %v977_v10 = vmul.f32 %v943_v3, %v943_v3 }
 0x1ed   :  { %v956_v62 = vpop.f32.mrf.mxu2 }
 0x1ee   :  { %v957_v63 = vadd.f32 %v956_v62, %v850_v61 }
 0x1ef   :  { %v944_v18 = vpop.f32.mrf.mxu1 }
 0x1f0   :  { %v961_v0 = vmul.f32 1.442695, %v957_v63  ;;  %v973_v16 = vsub.f32 0.0, %v957_v63  ;;  %v945_v22 = vadd.f32 %v944_v18, %v849_v1 }
 0x1f2   :  { %1517 = vpow2.f32 %v961_v0 }
 0x1f5   :  { %v958_v4 = vpop.f32.mrf.mxu2 }
 0x1f6   :  { %v959_v6 = vadd.f32 %v958_v4, %v850_v61 }
 0x1f8   :  { %v1518_v7 = vpop.eup %1517  ;;  %v963_v8 = vmul.f32 1.442695, %v959_v6 }
 0x1f9   :  { %v967_v11 = vmul.f32 %v1518_v7, %v965_v5  ;;  %v975_v12 = vmul.f32 %v1518_v7, %v1518_v7 }
 0x1fa   :  { %1519 = vpow2.f32 %v963_v8 }
 0x1fb   :  { %v969_v13 = vadd.f32 %v967_v11, %v943_v3  ;;  %v979_v14 = vadd.f32 %v977_v10, %v975_v12 }
 0x1fd   :  { %971 = vst [vmem:[%s1818_s8] sm:$0xff] %v969_v13  ;;  %v981_v17 = vmul.f32 0.5, %v979_v14 }
 0x1ff   :  { %v983_v20 = vadd.f32 %v981_v17, %v973_v16 }
 0x200   :  { %v1520_v21 = vpop.eup %1519 }
 0x201   :  { %v968_v23 = vmul.f32 %v1520_v21, %v966_v19  ;;  %v1411_v24 = vadd.f32 -0.5, %v983_v20 }
 0x203   :  { %v970_v25 = vadd.f32 %v968_v23, %v945_v22  ;;  %v992_v26 = vsel %vm990_vm0, %v1411_v24, 0.0 }
 0x204   :  { %995 = vadd.xlane.f32.xlu0 %v992_v26 }
 0x205   :  { %972 = vst [vmem:[%s1818_s8 + $0x8] sm:$0xff] %v970_v25 }
 0x277   :  { %v996_v27 = vpop.xlane.xlu0 %995 }
 0x278   :  { %v997_v28 = vrot.slane %v996_v27, 4 }
 0x27a   :  { %v998_v29 = vadd.f32 %v997_v28, %v996_v27 }
 0x27c   :  { %v999_v30 = vrot.slane %v998_v29, 2 }
 0x27e   :  { %v1000_v31 = vadd.f32 %v999_v30, %v998_v29 }
 0x280   :  { %v1001_v32 = vrot.slane %v1000_v31, 1 }
 0x282   :  { %v1002_v33 = vadd.f32 %v1001_v32, %v1000_v31 }
 0x284   :  { %1509 = vpush %v1002_v33 }
 0x2b5   :  { %s1510_s21 = spop %1509 }
 0x2b6   :  { %s1004_s22 = smul.f32 0.0625, %s1510_s21 }
 0x2b8   :  { %1006 = sst [smem:[#allocation6]] %s1004_s22 }
 0x2b9   :  { %1017 = dma.smem_to_hbm %s1564_s23, 16, %s1015_s20, [#allocation5]  }
 0x2ba   :  { %1559 = dma.done.wait [#allocation5], 16  }
 0x2bb   :  { %1560 = vsyncadd [#allocation5], 4294967280 }
 0x2bc   :  { %1024 = sfence }
 0x2bd   :  { %1025 = vsyncpa [#allocation4], 1 }
 0x2be   :  { %1026 = vsyncpa [#allocation5], 1 }

</bundles_post_ra>
